<compile_context>
chip_gen: v6e
topology: v6e:2x2x1
jax: 0.10.0
libtpu: 0.0.40
codegen_flags: <defaults>
</compile_context>

<pallas_src>
import jax
import jax.numpy as jnp
from jax.experimental import pallas as pl
from jax.experimental.pallas import tpu as pltpu


# ----------------------------------------------------------------------------
# Parameter init (mirrors Scalar.__init__)
# ----------------------------------------------------------------------------
def init_scalar_params(init_value: float) -> jax.Array:
    """Store the parameter permanently as a (1,) float32 array.

    Keeping the canonical storage 1-D (SMEM-friendly, pads to 4 bytes) avoids
    any reshape/cast in the forward hot path and lets the same array be passed
    directly as an SMEM / scalar-prefetch operand of consumer kernels.
    """
    return jnp.full((1,), init_value, dtype=jnp.float32)


# ----------------------------------------------------------------------------
# Recommended forward: no kernel at all (identity of a 4-byte payload)
# ----------------------------------------------------------------------------
def scalar_forward(constant_param: jax.Array) -> jax.Array:
    """Pallas-free equivalent of Scalar.forward(): returns the parameter."""
    # XLA folds this to a no-op; consumers needing a 0-d scalar index [0].
    return constant_param


# ----------------------------------------------------------------------------
# Kernel version (the harness mandates a Pallas kernel)
# ----------------------------------------------------------------------------
def _scalar_kernel(const_ref, out_ref):
    # Entire "forward pass": copy the scalar parameter through SMEM.
    out_ref[0] = const_ref[0]


# Built exactly once at import time (review item 2: hoist construction).
_SCALAR_PALLAS_CALL = pl.pallas_call(
    _scalar_kernel,
    out_shape=jax.ShapeDtypeStruct((1,), jnp.float32),
    in_specs=[pl.BlockSpec(memory_space=pltpu.MemorySpace.SMEM)],
    out_specs=pl.BlockSpec(memory_space=pltpu.MemorySpace.SMEM),
)

# Traced / Mosaic-compiled exactly once; subsequent calls hit the jit cache.
_scalar_pallas_jit = jax.jit(_SCALAR_PALLAS_CALL)


@jax.custom_vjp
def scalar_forward_pallas(constant_param_1d: jax.Array) -> jax.Array:
    """Pallas-kernel equivalent of Scalar.forward().

    Args:
      constant_param_1d: float32 array of shape (1,) holding the parameter.

    Returns:
      float32 array of shape (1,) equal to the parameter value.
    """
    return _scalar_pallas_jit(constant_param_1d)


def _scalar_forward_pallas_fwd(constant_param_1d):
    return _scalar_pallas_jit(constant_param_1d), None


def _scalar_forward_pallas_bwd(_, g):
    # Identity op: gradient passes straight through to the parameter.
    return (g,)


scalar_forward_pallas.defvjp(_scalar_forward_pallas_fwd, _scalar_forward_pallas_bwd)


if __name__ == "__main__":
    # Deterministic setup. Scalar has no random init and takes no inputs;
    # PRNGKey(0) is created only for harness consistency.
    _ = jax.random.PRNGKey(0)
    init_value = 0.5

    constant = init_scalar_params(init_value)

    # Recommended zero-overhead path.
    out_fast = jax.block_until_ready(scalar_forward(constant))

    # Pallas kernel path (compiled once via the module-level jit).
    out_kernel = jax.block_until_ready(scalar_forward_pallas(constant))

    # Gradient path: the parameter is learnable; custom_vjp keeps autodiff off
    # the Pallas custom call. d/dp (3 * p) == 3.
    grad = jax.block_until_ready(
        jax.grad(lambda p: 3.0 * scalar_forward_pallas(p)[0])(constant)
    )

    expected = float(jnp.float32(init_value))

    assert out_fast.shape == (1,) and out_fast.dtype == jnp.float32
    assert float(out_fast[0]) == expected

    assert out_kernel.shape == (1,) and out_kernel.dtype == jnp.float32
    assert float(out_kernel[0]) == expected

    assert grad.shape == (1,) and grad.dtype == jnp.float32
    assert abs(float(grad[0]) - 3.0) < 1e-6

    print("KERNEL_OK")
</pallas_src>

<mosaic_0001>
module attributes {stable_mosaic.version = 11 : i64} {
  func.func @_scalar_kernel(%arg0: memref<1xf32, #tpu.memory_space<smem>>, %arg1: memref<1xf32, #tpu.memory_space<smem>>) attributes {dimension_semantics = [], scalar_prefetch = 0 : i64, scratch_operands = 0 : i64, tpu.core_type = #tpu.core_type<tc>} {
    %c0 = arith.constant 0 : index
    %0 = memref.load %arg0[%c0] : memref<1xf32, #tpu.memory_space<smem>>
    %c0_0 = arith.constant 0 : index
    %1 = memref.load %arg1[%c0_0] : memref<1xf32, #tpu.memory_space<smem>>
    memref.store %0, %arg1[%c0_0] : memref<1xf32, #tpu.memory_space<smem>>
    return
  }
}

</mosaic_0001>

<bundles_post_ra>
// kernel: tpu_custom_call.1
= control target key start
LH: loop header
LB: loop body
LE: loop exit
PB: predicated region body
PF: predicated region fallthrough
CT: control target
= control target key end

     0   :  { %7 = vsyncpa [#allocation4], 0  ;;  %s37_s8 = smov [#allocation3]   ;;  %s54_s0 = inlined_call_operand.<no memory space> [shape: f32[1], index: 0, kind: input, shape index: {}]   ;;  %s55_s1 = inlined_call_operand.hbm [shape: f32[1], index: 1, kind: output, shape index: {}]  }
   0x1   :  { %12 = sst [smem:[#allocation3]] %s54_s0 }
   0x2   :  { %20 = dma.smem_to_hbm %s37_s8, 16, %s55_s1, [#allocation4]  }
   0x3   :  { %35 = dma.done.wait [#allocation4], 16  }
   0x4   :  { %36 = vsyncadd [#allocation4], 4294967280 }
   0x5   :  { %24 = sfence }
   0x6   :  { %25 = vsyncpa [#allocation4], 1 }

</bundles_post_ra>
